<compile_context>
chip_gen: v7x
topology: tpu7x:2x2x1
jax: 0.10.0
libtpu: 0.0.40
codegen_flags: <defaults>
</compile_context>

<pallas_src>
import jax
import jax.numpy as jnp
from jax.experimental import pallas as pl
from jax.experimental.pallas import tpu as pltpu

# ---- static hyperparameters (h) ----
N_SPEAKERS = 10
EMBED_DIM = 32                # h.speaker_embed_dim
IN_DIM = EMBED_DIM + 4        # embed + f0 mean/std (2) + slyps mean/std (2)
HID_DIM = EMBED_DIM * 2       # ConvStack hidden_dim == output_dim (64)
GLU_OUT = EMBED_DIM           # GLU output_dim (32)

# ---- packed parameter slab: one [SLAB_ROWS, 128] f32 VMEM input ----------
# Every block starts at a sublane offset that is a multiple of 8 and lane 0,
# so all in-kernel slices are cheap static views. Unused entries are zero.
NSPK_PAD   = 16               # speaker axis padded to a sublane multiple
ROW_TFUSED = 0                # [16, 64] embedding[i] @ w0[:32] + b0  (fused)
ROW_W_F0SL = 16               # [ 4, 64] w0 rows for concat(f0, slyps)
ROW_W1     = 24               # [64, 64]
ROW_W2     = 88               # [64, 64]
ROW_WA     = 152              # [64, 32] GLU proj, value half
ROW_WB     = 216              # [64, 32] GLU proj, gate half
ROW_B1     = 280              # [ 1, 64]
ROW_B2     = 288              # [ 1, 64]
ROW_BA     = 296              # [ 1, 32]
ROW_BB     = 304              # [ 1, 32]
SLAB_ROWS  = 312              # multiple of 8
SLAB_COLS  = 128              # exactly one lane tile

TB_MAX = 256                  # max batch rows per grid step (multiple of 8)


def speaker_encoder_kernel(sid_ref, feat_ref, w_ref, out_ref):
    batch = out_ref.shape[0]
    f32 = jnp.float32

    # --- layer 0, embedding path: onehot(speaker_id) @ T_fused -------------
    # T_fused already contains embedding @ w0[:32] + b0, so no separate
    # embedding gather, no emb @ W_emb matmul, no bias add.
    ids = sid_ref[...]                                                 # [B, 1] i32
    lane_iota = jax.lax.broadcasted_iota(jnp.int32, (batch, NSPK_PAD), 1)
    onehot = (lane_iota == ids).astype(f32)                            # [B, 16]
    h = jnp.dot(onehot, w_ref[ROW_TFUSED:ROW_TFUSED + NSPK_PAD, 0:HID_DIM],
                preferred_element_type=f32)                            # [B, 64]

    # --- layer 0, f0/slyps path: single [B,4] x [4,64] dot ------------------
    h = h + jnp.dot(feat_ref[...], w_ref[ROW_W_F0SL:ROW_W_F0SL + 4, 0:HID_DIM],
                    preferred_element_type=f32)
    h = jnp.maximum(h, 0.0)

    # --- ConvStack layers 1-2 (+ReLU); dropout is eval-mode identity --------
    h = jnp.dot(h, w_ref[ROW_W1:ROW_W1 + HID_DIM, 0:HID_DIM],
                preferred_element_type=f32) + w_ref[ROW_B1:ROW_B1 + 1, 0:HID_DIM]
    h = jnp.maximum(h, 0.0)
    h = jnp.dot(h, w_ref[ROW_W2:ROW_W2 + HID_DIM, 0:HID_DIM],
                preferred_element_type=f32) + w_ref[ROW_B2:ROW_B2 + 1, 0:HID_DIM]
    h = jnp.maximum(h, 0.0)

    # --- GLU with pre-split projection: a * sigmoid(b) ----------------------
    a = jnp.dot(h, w_ref[ROW_WA:ROW_WA + HID_DIM, 0:GLU_OUT],
                preferred_element_type=f32) + w_ref[ROW_BA:ROW_BA + 1, 0:GLU_OUT]
    b = jnp.dot(h, w_ref[ROW_WB:ROW_WB + HID_DIM, 0:GLU_OUT],
                preferred_element_type=f32) + w_ref[ROW_BB:ROW_BB + 1, 0:GLU_OUT]
    out_ref[...] = a * jax.nn.sigmoid(b)


def pack_params(params):
    """Pack all parameters into one [312, 128] f32 slab (single DMA descriptor).

    Folds embedding + w0[:32] + b0 offline into T_fused. Pure layout plumbing;
    do this once per parameter set.
    """
    w0, w1, w2, wg = params["w0"], params["w1"], params["w2"], params["wg"]
    # Fused table: row i = embedding[i] @ w0[:EMBED_DIM] + b0  (exact fold)
    t_fused = params["embedding"] @ w0[0:EMBED_DIM, :] + params["b0"].reshape(1, -1)

    slab = jnp.zeros((SLAB_ROWS, SLAB_COLS), jnp.float32)
    slab = slab.at[ROW_TFUSED:ROW_TFUSED + N_SPEAKERS, 0:HID_DIM].set(t_fused)
    slab = slab.at[ROW_W_F0SL:ROW_W_F0SL + 4, 0:HID_DIM].set(w0[EMBED_DIM:EMBED_DIM + 4, :])
    slab = slab.at[ROW_W1:ROW_W1 + HID_DIM, 0:HID_DIM].set(w1)
    slab = slab.at[ROW_W2:ROW_W2 + HID_DIM, 0:HID_DIM].set(w2)
    # torch.chunk(2, dim=-1): first half = value path, second half = gate path.
    slab = slab.at[ROW_WA:ROW_WA + HID_DIM, 0:GLU_OUT].set(wg[:, 0:GLU_OUT])
    slab = slab.at[ROW_WB:ROW_WB + HID_DIM, 0:GLU_OUT].set(wg[:, GLU_OUT:])
    slab = slab.at[ROW_B1, 0:HID_DIM].set(params["b1"].reshape(-1))
    slab = slab.at[ROW_B2, 0:HID_DIM].set(params["b2"].reshape(-1))
    slab = slab.at[ROW_BA, 0:GLU_OUT].set(params["bg"].reshape(-1)[0:GLU_OUT])
    slab = slab.at[ROW_BB, 0:GLU_OUT].set(params["bg"].reshape(-1)[GLU_OUT:])
    return slab


def speaker_encoder(speaker_id, speaker_f0_meanstd, speaker_slyps_meanstd, slab):
    batch = speaker_id.shape[0]

    # Clamp ids (out-of-range would otherwise select a zero-padded table row).
    sid = jnp.clip(speaker_id.astype(jnp.int32), 0, N_SPEAKERS - 1).reshape(batch, 1)
    # Single [B,4] feature input: one DMA, one layer-0 matmul.
    feat = jnp.concatenate(
        [speaker_f0_meanstd.astype(jnp.float32),
         speaker_slyps_meanstd.astype(jnp.float32)], axis=1)

    # Pad batch to a multiple of the batch tile (f32 sublane tile = 8).
    b_pad = ((batch + 7) // 8) * 8
    tb = min(TB_MAX, b_pad)                       # multiple of 8 by construction
    b_pad = ((b_pad + tb - 1) // tb) * tb         # no partial grid blocks
    if b_pad != batch:
        sid = jnp.pad(sid, ((0, b_pad - batch), (0, 0)))
        feat = jnp.pad(feat, ((0, b_pad - batch), (0, 0)))

    grid = (pl.cdiv(b_pad, tb),)
    out = pl.pallas_call(
        speaker_encoder_kernel,
        out_shape=jax.ShapeDtypeStruct((b_pad, GLU_OUT), jnp.float32),
        grid=grid,
        in_specs=[
            pl.BlockSpec((tb, 1), lambda i: (i, 0)),                 # speaker ids
            pl.BlockSpec((tb, 4), lambda i: (i, 0)),                 # f0 + slyps
            pl.BlockSpec((SLAB_ROWS, SLAB_COLS), lambda i: (0, 0)),  # weight slab
        ],
        out_specs=pl.BlockSpec((tb, GLU_OUT), lambda i: (i, 0)),
        compiler_params=pltpu.CompilerParams(
            dimension_semantics=("parallel",)),   # shards batch across v7x TCs
    )(sid, feat, slab)
    return out[:batch]


def init_params(key):
    ks = jax.random.split(key, 16)

    def dense(k, fan_in, fan_out, scale=0.1):
        return jax.random.normal(k, (fan_in, fan_out), jnp.float32) * scale

    def bias(k, dim):
        return jax.random.normal(k, (1, dim), jnp.float32) * 0.01

    return {
        # nn.Embedding(n_speakers, speaker_embed_dim)
        "embedding": jax.random.normal(ks[0], (N_SPEAKERS, EMBED_DIM), jnp.float32),
        # ConvStack layer 0: (E+4) -> 2E
        "w0": dense(ks[1], IN_DIM, HID_DIM), "b0": bias(ks[2], HID_DIM),
        # ConvStack layer 1: 2E -> 2E
        "w1": dense(ks[3], HID_DIM, HID_DIM), "b1": bias(ks[4], HID_DIM),
        # ConvStack layer 2: 2E -> 2E
        "w2": dense(ks[5], HID_DIM, HID_DIM), "b2": bias(ks[6], HID_DIM),
        # GLU projection: 2E -> 2*E
        "wg": dense(ks[7], HID_DIM, 2 * GLU_OUT), "bg": bias(ks[8], 2 * GLU_OUT),
    }


def speaker_encoder_ref(speaker_id, f0, slyps, params):
    """Pure-JAX reference identical to the PyTorch forward (eval mode)."""
    emb = params["embedding"][speaker_id]
    x = jnp.concatenate([emb, f0, slyps], axis=1).astype(jnp.float32)
    h = jnp.maximum(x @ params["w0"] + params["b0"], 0.0)
    h = jnp.maximum(h @ params["w1"] + params["b1"], 0.0)
    h = jnp.maximum(h @ params["w2"] + params["b2"], 0.0)
    g = h @ params["wg"] + params["bg"]
    a, b = g[:, :GLU_OUT], g[:, GLU_OUT:]
    return a * jax.nn.sigmoid(b)


if __name__ == "__main__":
    root = jax.random.PRNGKey(0)
    pkey, ikey = jax.random.split(root)
    params = init_params(pkey)
    slab = pack_params(params)

    # Batch of 8 = one full f32 sublane tile; also exercise a non-multiple-of-8
    # batch (5) to cover the wrapper padding path.
    for B in (8, 5):
        k1, k2, k3 = jax.random.split(jax.random.fold_in(ikey, B), 3)
        speaker_id = jax.random.randint(k1, (B,), 0, N_SPEAKERS, dtype=jnp.int32)
        speaker_f0_meanstd = jax.random.normal(k2, (B, 2), jnp.float32)
        speaker_slyps_meanstd = jax.random.normal(k3, (B, 2), jnp.float32)

        out = speaker_encoder(speaker_id, speaker_f0_meanstd,
                              speaker_slyps_meanstd, slab)
        out = jax.block_until_ready(out)
        assert out.shape == (B, GLU_OUT), out.shape
        assert out.dtype == jnp.float32

        ref = speaker_encoder_ref(speaker_id, speaker_f0_meanstd,
                                  speaker_slyps_meanstd, params)
        ref = jax.block_until_ready(ref)
        assert jnp.allclose(out, ref, atol=2e-3, rtol=2e-3), \
            float(jnp.max(jnp.abs(out - ref)))

    print("KERNEL_OK")
</pallas_src>

<mosaic_0001>
module attributes {stable_mosaic.version = 11 : i64} {
  func.func @speaker_encoder_kernel(%arg0: i32, %arg1: memref<8x1xi32, #tpu.memory_space<vmem>>, %arg2: memref<8x4xf32, #tpu.memory_space<vmem>>, %arg3: memref<312x128xf32, #tpu.memory_space<vmem>>, %arg4: memref<8x32xf32, #tpu.memory_space<vmem>>) attributes {dimension_semantics = [#tpu.dimension_semantics<parallel>], iteration_bounds = array<i64: 1>, scalar_prefetch = 0 : i64, scratch_operands = 0 : i64, tpu.core_type = #tpu.core_type<tc>, window_params = [{transform_indices = @transform_0, window_bounds = array<i64: 8, 1>}, {transform_indices = @transform_1, window_bounds = array<i64: 8, 4>}, {pipeline_mode = #tpu.pipeline_mode<synchronous>, transform_indices = @transform_2, window_bounds = array<i64: 312, 128>}, {transform_indices = @transform_3, window_bounds = array<i64: 8, 32>}]} {
    %c0 = arith.constant 0 : index
    %c0_0 = arith.constant 0 : index
    %0 = vector.load %arg1[%c0, %c0_0] : memref<8x1xi32, #tpu.memory_space<vmem>>, vector<8x1xi32>
    %1 = tpu.iota {dimensions = array<i32: 1>} : vector<8x16xi32>
    %2 = vector.broadcast %0 : vector<8x1xi32> to vector<8x16xi32>
    %3 = arith.cmpi eq, %1, %2 : vector<8x16xi32>
    %4 = arith.extui %3 : vector<8x16xi1> to vector<8x16xi32>
    %5 = arith.sitofp %4 : vector<8x16xi32> to vector<8x16xf32>
    %c0_1 = arith.constant 0 : index
    %c0_2 = arith.constant 0 : index
    %6 = vector.load %arg3[%c0_1, %c0_2] : memref<312x128xf32, #tpu.memory_space<vmem>>, vector<16x64xf32>
    %cst = arith.constant dense<0.000000e+00> : vector<8x64xf32>
    %7 = tpu.matmul %5, %6, %cst {dimension_numbers = #tpu.dot_dimension_numbers<[1], [0], [0], [1], [0, 0, 1, 1], [], []>} : vector<8x16xf32>, vector<16x64xf32>, vector<8x64xf32> -> vector<8x64xf32>
    %c0_3 = arith.constant 0 : index
    %c0_4 = arith.constant 0 : index
    %8 = vector.load %arg2[%c0_3, %c0_4] : memref<8x4xf32, #tpu.memory_space<vmem>>, vector<8x4xf32>
    %c16 = arith.constant 16 : index
    %c0_5 = arith.constant 0 : index
    %9 = vector.load %arg3[%c16, %c0_5] : memref<312x128xf32, #tpu.memory_space<vmem>>, vector<4x64xf32>
    %cst_6 = arith.constant dense<0.000000e+00> : vector<8x64xf32>
    %10 = tpu.matmul %8, %9, %cst_6 {dimension_numbers = #tpu.dot_dimension_numbers<[1], [0], [0], [1], [0, 0, 1, 1], [], []>} : vector<8x4xf32>, vector<4x64xf32>, vector<8x64xf32> -> vector<8x64xf32>
    %11 = arith.addf %7, %10 : vector<8x64xf32>
    %cst_7 = arith.constant 0.000000e+00 : f32
    %12 = vector.broadcast %cst_7 : f32 to vector<8x64xf32>
    %13 = arith.maximumf %11, %12 : vector<8x64xf32>
    %c24 = arith.constant 24 : index
    %c0_8 = arith.constant 0 : index
    %14 = vector.load %arg3[%c24, %c0_8] : memref<312x128xf32, #tpu.memory_space<vmem>>, vector<64x64xf32>
    %cst_9 = arith.constant dense<0.000000e+00> : vector<8x64xf32>
    %15 = tpu.matmul %13, %14, %cst_9 {dimension_numbers = #tpu.dot_dimension_numbers<[1], [0], [0], [1], [0, 0, 1, 1], [], []>} : vector<8x64xf32>, vector<64x64xf32>, vector<8x64xf32> -> vector<8x64xf32>
    %c280 = arith.constant 280 : index
    %c0_10 = arith.constant 0 : index
    %16 = vector.load %arg3[%c280, %c0_10] : memref<312x128xf32, #tpu.memory_space<vmem>>, vector<1x64xf32>
    %17 = vector.broadcast %16 : vector<1x64xf32> to vector<8x64xf32>
    %18 = arith.addf %15, %17 : vector<8x64xf32>
    %cst_11 = arith.constant 0.000000e+00 : f32
    %19 = vector.broadcast %cst_11 : f32 to vector<8x64xf32>
    %20 = arith.maximumf %18, %19 : vector<8x64xf32>
    %c88 = arith.constant 88 : index
    %c0_12 = arith.constant 0 : index
    %21 = vector.load %arg3[%c88, %c0_12] : memref<312x128xf32, #tpu.memory_space<vmem>>, vector<64x64xf32>
    %cst_13 = arith.constant dense<0.000000e+00> : vector<8x64xf32>
    %22 = tpu.matmul %20, %21, %cst_13 {dimension_numbers = #tpu.dot_dimension_numbers<[1], [0], [0], [1], [0, 0, 1, 1], [], []>} : vector<8x64xf32>, vector<64x64xf32>, vector<8x64xf32> -> vector<8x64xf32>
    %c288 = arith.constant 288 : index
    %c0_14 = arith.constant 0 : index
    %23 = vector.load %arg3[%c288, %c0_14] : memref<312x128xf32, #tpu.memory_space<vmem>>, vector<1x64xf32>
    %24 = vector.broadcast %23 : vector<1x64xf32> to vector<8x64xf32>
    %25 = arith.addf %22, %24 : vector<8x64xf32>
    %cst_15 = arith.constant 0.000000e+00 : f32
    %26 = vector.broadcast %cst_15 : f32 to vector<8x64xf32>
    %27 = arith.maximumf %25, %26 : vector<8x64xf32>
    %c152 = arith.constant 152 : index
    %c0_16 = arith.constant 0 : index
    %28 = vector.load %arg3[%c152, %c0_16] : memref<312x128xf32, #tpu.memory_space<vmem>>, vector<64x32xf32>
    %cst_17 = arith.constant dense<0.000000e+00> : vector<8x32xf32>
    %29 = tpu.matmul %27, %28, %cst_17 {dimension_numbers = #tpu.dot_dimension_numbers<[1], [0], [0], [1], [0, 0, 1, 1], [], []>} : vector<8x64xf32>, vector<64x32xf32>, vector<8x32xf32> -> vector<8x32xf32>
    %c296 = arith.constant 296 : index
    %c0_18 = arith.constant 0 : index
    %30 = vector.load %arg3[%c296, %c0_18] : memref<312x128xf32, #tpu.memory_space<vmem>>, vector<1x32xf32>
    %31 = vector.broadcast %30 : vector<1x32xf32> to vector<8x32xf32>
    %32 = arith.addf %29, %31 : vector<8x32xf32>
    %c216 = arith.constant 216 : index
    %c0_19 = arith.constant 0 : index
    %33 = vector.load %arg3[%c216, %c0_19] : memref<312x128xf32, #tpu.memory_space<vmem>>, vector<64x32xf32>
    %cst_20 = arith.constant dense<0.000000e+00> : vector<8x32xf32>
    %34 = tpu.matmul %27, %33, %cst_20 {dimension_numbers = #tpu.dot_dimension_numbers<[1], [0], [0], [1], [0, 0, 1, 1], [], []>} : vector<8x64xf32>, vector<64x32xf32>, vector<8x32xf32> -> vector<8x32xf32>
    %c304 = arith.constant 304 : index
    %c0_21 = arith.constant 0 : index
    %35 = vector.load %arg3[%c304, %c0_21] : memref<312x128xf32, #tpu.memory_space<vmem>>, vector<1x32xf32>
    %36 = vector.broadcast %35 : vector<1x32xf32> to vector<8x32xf32>
    %37 = arith.addf %34, %36 : vector<8x32xf32>
    %38 = arith.negf %37 : vector<8x32xf32>
    %39 = math.exp %38 : vector<8x32xf32>
    %cst_22 = arith.constant 1.000000e+00 : f32
    %40 = vector.broadcast %cst_22 : f32 to vector<8x32xf32>
    %41 = arith.addf %40, %39 : vector<8x32xf32>
    %42 = arith.divf %40, %41 : vector<8x32xf32>
    %43 = arith.mulf %32, %42 : vector<8x32xf32>
    %c0_23 = arith.constant 0 : index
    %c0_24 = arith.constant 0 : index
    %44 = vector.load %arg4[%c0_23, %c0_24] : memref<8x32xf32, #tpu.memory_space<vmem>>, vector<8x32xf32>
    tpu.vector_store %arg4[%c0_23, %c0_24], %43 {strides = array<i32>} : memref<8x32xf32, #tpu.memory_space<vmem>>, vector<8x32xf32>,
    return
  }
  func.func @transform_0(%arg0: i32) -> (i32, i32) {
    %c0_i32 = arith.constant 0 : i32
    %c0_i32_0 = arith.constant 0 : i32
    return %arg0, %c0_i32 : i32, i32
  }
  func.func @transform_1(%arg0: i32) -> (i32, i32) {
    %c0_i32 = arith.constant 0 : i32
    %c0_i32_0 = arith.constant 0 : i32
    return %arg0, %c0_i32 : i32, i32
  }
  func.func @transform_2(%arg0: i32) -> (i32, i32) {
    %c0_i32 = arith.constant 0 : i32
    %c0_i32_0 = arith.constant 0 : i32
    %c0_i32_1 = arith.constant 0 : i32
    return %c0_i32, %c0_i32_0 : i32, i32
  }
  func.func @transform_3(%arg0: i32) -> (i32, i32) {
    %c0_i32 = arith.constant 0 : i32
    %c0_i32_0 = arith.constant 0 : i32
    return %arg0, %c0_i32 : i32, i32
  }
}

</mosaic_0001>

<bundles_post_ra>
// kernel: tpu_custom_call.1
= control target key start
LH: loop header
LB: loop body
LE: loop exit
PB: predicated region body
PF: predicated region fallthrough
CT: control target
= control target key end

     0   :  { %8 = vsyncpa [#allocation3], 0  ;;  %s911_s0 = inlined_call_operand.vmem [shape: s32[8,1], index: 0, kind: input, shape index: {}]   ;;  %s912_s1 = inlined_call_operand.vmem [shape: f32[8,4], index: 1, kind: input, shape index: {}]   ;;  %s913_s2 = inlined_call_operand.hbm [shape: f32[312,128], index: 2, kind: input, shape index: {}]   ;;  %s914_s3 = inlined_call_operand.hbm [shape: f32[8,32], index: 3, kind: output, shape index: {}]  }
   0x1   :  { %9 = vsyncpa [#allocation4], 0  ;;  %s818_s12 = smov [#allocation2]   ;;  %s770_s16 = scalar_lea.hbm %s913_s2, 4992 }
   0x2   :  { %s19_s13 = sshll.u32 %s818_s12, 4  ;;  %p771_p0 = scmp.ne.s32.totalorder %s913_s2, %s770_s16  ;;  %s20_s13 = int_to_ptr.vmem [resolvable:$true] %s19_s13 }
   0x3   :  { %p774_p1 = scmp.lt.u32.totalorder %s770_s16, %s913_s2 }
   0x5   :  { %p776_p2 = pnand %p774_p1, %p771_p0 }
   0x7   :  { %779 = shalt.err (!%p776_p2)
}
   0x8   :  { %s780_s21 = scalar_lea.vmem %s20_s13, 4992  ;;  %p785_p4 = scmp.lt.s32.totalorder %s20_s13, %s20_s13 }
   0x9   :  { %p781_p3 = scmp.ne.s32.totalorder %s20_s13, %s780_s21  ;;  %p786_p5 = scmp.lt.s32.totalorder %s780_s21, %s780_s21 }
   0xb   :  { %p787_p6 = por %p786_p5, %p785_p4 }
   0xd   :  { %p788_p7 = pnand %p787_p6, %p781_p3 }
   0xf   :  { %791 = shalt.err (!%p788_p7)
}
  0x10   :  { %s819_s22 = smov 128   ;;  %s820_s23 = smov 8  }
  0x11   :  { %25 = dma.hbm_to_vmem [thread:$0]  %s913_s2, 4992, %s20_s13, [#allocation3], %s819_s22, %s819_s22, %s820_s23  }
  0x12   :  { %814 = dma.done.wait [#allocation3], 4992  }
  0x13   :  { %815 = vsyncadd [#allocation3], 4294962304  ;;  %v821_v0 = vmov 0   ;;  %v822_v1 = vmov 0.0|0.0   ;;  %v823_v2 = vmov 0.0   ;;  %v29_v3 = vld [vmem:[%s911_s0] sm:$0xff]  ;;  %v30_v18 = vlaneseq }
  0x14   :  { %765 = vset.pattern.permute.xlu0 %v821_v0  ;;  %705 = vmatprep.subr.bf16.mxu0 %v822_v1  ;;  %v38_v4 = vld [vmem:[#allocation2] sm:$0xff]  ;;  %v39_v5 = vld [vmem:[#allocation2 + $0x8] sm:$0xff]  ;;  %vm46_vm0 = vcmask 1043456   ;;  %v41_v7 = vld [vmem:[#allocation2 + $0x10] sm:$0xf]  ;;  %vm824_vm1 = vmmov 0  }
  0x15   :  { %617 = vmatprep.subr.mxu1 %v823_v2  ;;  %33 = vperm.xlu0 %765, %v29_v3   ;;  %v706_v6 = vpack.c.bf16 %v39_v5, %v38_v4  ;;  %v40_v8 = vld [vmem:[%s912_s1] sm:$0xff]  ;;  %vm42_vm2 = vcmask 31744   ;;  %v195_v9 = vld [vmem:[#allocation2 + $0x18] sm:$0xff]  ;;  %v197_v11 = vld [vmem:[#allocation2 + $0x28] sm:$0xff]  ;;  %v31_v19 = vand.u32 127, %v30_v18  ;;  %vm120_vm3 = vcmask 130048  }
  0x16   :  { %619 = vmatprep.mubr.msk.f32.mxu1 %vm824_vm1, %v823_v2  ;;  %618 = vmatpush3.msk.msra.mxu1 %vm46_vm0, %v41_v7  ;;  %v196_v10 = vld [vmem:[#allocation2 + $0x20] sm:$0xff]  ;;  %v198_v13 = vld [vmem:[#allocation2 + $0x30] sm:$0xff]  ;;  %v199_v15 = vld [vmem:[#allocation2 + $0x38] sm:$0xff]  ;;  %vm208_vm5 = vcmask 523264   ;;  %s825_s0 = smov [#allocation5]   ;;  %vm546_vm6 = vcmask 261120  }
  0x17   :  { %626 = vmatprep.mubr.msk.f32.mxu0 %vm824_vm1, %v823_v2  ;;  %707 = vmatpush3.bf16.msra.mxu0 %v706_v6  ;;  %v709_v12 = vpack.c.bf16 %v196_v10, %v195_v9  ;;  %v712_v14 = vpack.c.bf16 %v198_v13, %v197_v11  ;;  %v200_v16 = vld [vmem:[#allocation2 + $0x40] sm:$0xff]  ;;  %v201_v22 = vld [vmem:[#allocation2 + $0x48] sm:$0xff]  ;;  %v202_v23 = vld [vmem:[#allocation2 + $0x50] sm:$0xff]  ;;  %s554_s1 = sshll.u32 %s825_s0, 4  ;;  %s555_s1 = int_to_ptr.vmem [resolvable:$true] %s554_s1 }
  0x18   :  { %620 = vmatmul.mubr.msk.f32.vlgmr.msra.gmra.mrb[0].mxu1 %vm42_vm2, %v40_v8  ;;  %708 = vmatprep.subr.bf16.mxu1 %v822_v1  ;;  %v715_v17 = vpack.c.bf16 %v200_v16, %v199_v15  ;;  %v718_v25 = vpack.c.bf16 %v202_v23, %v201_v22  ;;  %v283_v27 = vld [vmem:[#allocation2 + $0x58] sm:$0xff]  ;;  %v284_v28 = vld [vmem:[#allocation2 + $0x60] sm:$0xff]  ;;  %v285_v29 = vld [vmem:[#allocation2 + $0x68] sm:$0xff]  ;;  %s792_s29 = scalar_lea.vmem %s555_s1, 128  ;;  %p797_p9 = scmp.lt.s32.totalorder %s555_s1, %s555_s1 }
  0x19   :  { %645 = vmatprep.mubr.msk.f32.mxu1 %vm824_vm1, %v823_v2  ;;  %720 = vmatprep.subr.bf16.mxu0 %v822_v1  ;;  %v721_v30 = vpack.c.bf16 %v284_v28, %v283_v27  ;;  %v286_v31 = vld [vmem:[#allocation2 + $0x70] sm:$0xff]  ;;  %v287_v33 = vld [vmem:[#allocation2 + $0x78] sm:$0xff]  ;;  %v288_v34 = vld [vmem:[#allocation2 + $0x80] sm:$0xff]  ;;  %p793_p8 = scmp.ne.s32.totalorder %s555_s1, %s792_s29  ;;  %p798_p10 = scmp.lt.s32.totalorder %s792_s29, %s792_s29 }
  0x1a   :  { %710 = vmatpush3.bf16.msra.mxu1 %v709_v12  ;;  %v724_v32 = vpack.c.bf16 %v286_v31, %v285_v29  ;;  %v727_v35 = vpack.c.bf16 %v288_v34, %v287_v33  ;;  %v289_v40 = vld [vmem:[#allocation2 + $0x88] sm:$0xff]  ;;  %v290_v41 = vld [vmem:[#allocation2 + $0x90] sm:$0xff]  ;;  %v370_v43 = vld [vmem:[#allocation2 + $0x98] sm:$0xff] }
  0x1b   :  { %711 = vmatprep.subr.bf16.mxu1 %v822_v1  ;;  %v730_v42 = vpack.c.bf16 %v290_v41, %v289_v40  ;;  %v371_v44 = vld [vmem:[#allocation2 + $0xa0] sm:$0xff]  ;;  %v372_v46 = vld [vmem:[#allocation2 + $0xa8] sm:$0xff]  ;;  %v373_v47 = vld [vmem:[#allocation2 + $0xb0] sm:$0xff]  ;;  %p799_p11 = por %p798_p10, %p797_p9 }
  0x1c   :  { %v733_v45 = vpack.c.bf16 %v371_v44, %v370_v43  ;;  %v736_v48 = vpack.c.bf16 %v373_v47, %v372_v46  ;;  %v374_v49 = vld [vmem:[#allocation2 + $0xb8] sm:$0xff]  ;;  %v375_v50 = vld [vmem:[#allocation2 + $0xc0] sm:$0xff]  ;;  %v458_v60 = vld [vmem:[#allocation2 + $0xe8] sm:$0xff] }
  0x1d   :  { %v739_v51 = vpack.c.bf16 %v375_v50, %v374_v49  ;;  %v567_v52 = vld [vmem:[#allocation2 + $0x118] ss:$0 sm:$0xff]  ;;  %v457_v54 = vld [vmem:[#allocation2 + $0xe0] sm:$0xff]  ;;  %v459_v61 = vld [vmem:[#allocation2 + $0xf0] sm:$0xff]  ;;  %p800_p12 = pnand %p799_p11, %p793_p8 }
  0x1e   :  { %713 = vmatpush3.bf16.msra.mxu1 %v712_v14  ;;  %v456_v53 = vld [vmem:[#allocation2 + $0xd8] sm:$0xff]  ;;  %v748_v62 = vpack.c.bf16 %v459_v61, %v458_v60  ;;  %v461_v0 = vld [vmem:[#allocation2 + $0x100] sm:$0xff]  ;;  %v376_v4 = vld [vmem:[#allocation2 + $0xc8] sm:$0xff] }
  0x1f   :  { %714 = vmatprep.subr.bf16.mxu1 %v822_v1  ;;  %v745_v58 = vpack.c.bf16 %v457_v54, %v456_v53  ;;  %v460_v63 = vld [vmem:[#allocation2 + $0xf8] sm:$0xff]  ;;  %v377_v5 = vld [vmem:[#allocation2 + $0xd0] sm:$0xff]  ;;  %v462_v6 = vld [vmem:[#allocation2 + $0x108] sm:$0xff] }
  0x20   :  { %v751_v3 = vpack.c.bf16 %v461_v0, %v460_v63  ;;  %v742_v7 = vpack.c.bf16 %v377_v5, %v376_v4  ;;  %v463_v8 = vld [vmem:[#allocation2 + $0x110] sm:$0xff]  ;;  %v571_v22 = vld [vmem:[#allocation2 + $0x128] ss:$0 sm:$0xff] }
  0x21   :  { %v754_v9 = vpack.c.bf16 %v463_v8, %v462_v6  ;;  %v573_v14 = vld [vmem:[#allocation2 + $0x130] ss:$0 sm:$0xff] }
  0x22   :  { %716 = vmatpush3.bf16.msra.mxu1 %v715_v17 }
  0x23   :  { %717 = vmatprep.subr.bf16.mxu1 %v822_v1 }
  0x26   :  { %719 = vmatpush3.bf16.msra.mxu1 %v718_v25 }
  0x27   :  { %732 = vmatprep.subr.bf16.mxu1 %v822_v1 }
  0x94   :  { %v34_v20 = vpop.permute.xlu0 %33 }
  0x95   :  { %vm35_vm4 = vcmp.eq.s32.totalorder %v31_v19, %v34_v20 }
  0x96   :  { %v563_v21 = vsel %vm35_vm4, 1.0, %v823_v2 }
  0x97   :  { %627 = vmatmul.mubr.msk.f32.vlgmr.msra.gmra.mrb[0].mxu0 %vm120_vm3, %v563_v21 }
  0x98   :  { %664 = vmatprep.mubr.msk.f32.mxu0 %vm824_vm1, %v823_v2  ;;  %722 = vmatpush3.bf16.msra.mxu0 %v721_v30 }
  0x99   :  { %723 = vmatprep.subr.bf16.mxu0 %v822_v1 }
  0x9c   :  { %725 = vmatpush3.bf16.msra.mxu0 %v724_v32 }
  0x9d   :  { %726 = vmatprep.subr.bf16.mxu0 %v822_v1 }
  0xa0   :  { %728 = vmatpush3.bf16.msra.mxu0 %v727_v35 }
  0xa1   :  { %729 = vmatprep.subr.bf16.mxu0 %v822_v1 }
  0xa4   :  { %731 = vmatpush3.bf16.msra.mxu0 %v730_v42 }
  0xa5   :  { %744 = vmatprep.subr.bf16.mxu0 %v822_v1 }
  0xeb   :  { %v116_v24 = vpop.f32.mrb[0].mxu1 }
  0xec   :  { %v621_v26 = vpop.f32.mrb[1].mxu1 }
 0x16a   :  { %v190_v36 = vpop.f32.mrb[0].mxu0 }
 0x16b   :  { %v191_v37 = vadd.f32 %v190_v36, %v116_v24  ;;  %v628_v38 = vpop.f32.mrb[1].mxu0 }
 0x16d   :  { %v194_v39 = vmax.f32 %v191_v37, 0.0 }
 0x16f   :  { %646 = vmatmul.mubr.msk.f32.vlgmr.msra.gmra.mrb[2].mxu1 %vm208_vm5, %v194_v39 }
 0x170   :  { %683 = vmatprep.mubr.msk.f32.mxu1 %vm824_vm1, %v823_v2  ;;  %734 = vmatpush3.bf16.msra.mxu1 %v733_v45 }
 0x171   :  { %735 = vmatprep.subr.bf16.mxu1 %v822_v1 }
 0x174   :  { %737 = vmatpush3.bf16.msra.mxu1 %v736_v48 }
 0x175   :  { %738 = vmatprep.subr.bf16.mxu1 %v822_v1 }
 0x178   :  { %740 = vmatpush3.bf16.msra.mxu1 %v739_v51 }
 0x179   :  { %741 = vmatprep.subr.bf16.mxu1 %v822_v1 }
 0x17c   :  { %743 = vmatpush3.bf16.msra.mxu1 %v742_v7 }
 0x242   :  { %v278_v55 = vpop.f32.mrb[2].mxu1 }
 0x243   :  { %v279_v56 = vadd.f32 %v567_v52, %v278_v55  ;;  %v647_v57 = vpop.f32.mrb[3].mxu1 }
 0x245   :  { %v282_v59 = vmax.f32 %v279_v56, 0.0 }
 0x247   :  { %665 = vmatmul.mubr.msk.f32.vlgmr.msra.gmra.mrb[2].mxu0 %vm208_vm5, %v282_v59 }
 0x248   :  { %746 = vmatpush3.bf16.msra.mxu0 %v745_v58  ;;  %702 = vmatprep.mubr.msk.f32.mxu0 %vm824_vm1, %v823_v2  ;;  %v569_v2 = vld [vmem:[#allocation2 + $0x120] ss:$0 sm:$0xff] }
 0x249   :  { %747 = vmatprep.subr.bf16.mxu0 %v822_v1 }
 0x24c   :  { %749 = vmatpush3.bf16.msra.mxu0 %v748_v62 }
 0x24d   :  { %750 = vmatprep.subr.bf16.mxu0 %v822_v1 }
 0x250   :  { %752 = vmatpush3.bf16.msra.mxu0 %v751_v3 }
 0x251   :  { %753 = vmatprep.subr.bf16.mxu0 %v822_v1 }
 0x254   :  { %755 = vmatpush3.bf16.msra.mxu0 %v754_v9 }
 0x31a   :  { %v365_v10 = vpop.f32.mrb[2].mxu0 }
 0x31b   :  { %v366_v11 = vadd.f32 %v569_v2, %v365_v10  ;;  %v666_v12 = vpop.f32.mrb[3].mxu0 }
 0x31d   :  { %v369_v13 = vmax.f32 %v366_v11, 0.0 }
 0x31f   :  { %684 = vmatmul.mubr.msk.f32.vlgmr.msra.gmra.mrb[4].mxu1 %vm208_vm5, %v369_v13  ;;  %703 = vmatmul.mubr.msk.f32.vlgmr.msra.gmra.mrb[4].mxu0 %vm208_vm5, %v369_v13 }
 0x3f2   :  { %v452_v15 = vpop.f32.mrb[4].mxu1  ;;  %v535_v1 = vpop.f32.mrb[4].mxu0 }
 0x3f3   :  { %v536_v16 = vadd.f32 %v573_v14, %v535_v1  ;;  %v685_v17 = vpop.f32.mrb[5].mxu1  ;;  %v704_v18 = vpop.f32.mrb[5].mxu0  ;;  %v453_v23 = vadd.f32 %v571_v22, %v452_v15 }
 0x3f5   :  { %v575_v19 = vmul.f32 -1.442695, %v536_v16 }
 0x3f7   :  { %766 = vpow2.f32 %v575_v19 }
 0x401   :  { %v767_v20 = vpop.eup %766 }
 0x402   :  { %v542_v21 = vadd.f32 1.0, %v767_v20 }
 0x404   :  { %768 = vrcp.f32 %v542_v21 }
 0x40e   :  { %v769_v24 = vpop.eup %768 }
 0x40f   :  { %v545_v25 = vmul.f32 %v769_v24, %v453_v23 }
 0x411   :  { %547 = vst.msk [vmem:[#allocation5] sm:$0xff] %vm546_vm6, %v545_v25 }
 0x412   :  { %803 = shalt.err (!%p800_p12)
}
 0x413   :  { %s804_s5 = scalar_lea.hbm %s914_s3, 128 }
 0x414   :  { %p805_p13 = scmp.ne.s32.totalorder %s914_s3, %s804_s5  ;;  %p808_p0 = scmp.lt.u32.totalorder %s804_s5, %s914_s3 }
 0x416   :  { %p810_p1 = pnand %p808_p0, %p805_p13 }
 0x418   :  { %813 = shalt.err (!%p810_p1)
}
 0x419   :  { %557 = dma.vmem_to_hbm [thread:$0]  %s555_s1, 128, %s914_s3, [#allocation4]  }
 0x41a   :  { %816 = dma.done.wait [#allocation4], 128  }
 0x41b   :  { %817 = vsyncadd [#allocation4], 4294967168 }
 0x41c   :  { %561 = vsyncpa [#allocation3], 1 }
 0x41d   :  { %562 = vsyncpa [#allocation4], 1 }

</bundles_post_ra>
